<compile_context>
chip_gen: v7x
topology: tpu7x:2x2x1
jax: 0.10.0
libtpu: 0.0.40
codegen_flags: <defaults>
</compile_context>

<pallas_src>
import jax
import jax.numpy as jnp
from jax import lax
from jax.experimental import pallas as pl
from jax.experimental.pallas import tpu as pltpu

_LANE = 128
_SUBLANE = 8
_TILE_ROWS = 2048  # 2048 * 128 * 4 B = 1 MiB per fp32 block


def _round_up(n: int, m: int) -> int:
    return ((n + m - 1) // m) * m


def _stoch_binarize_kernel(seed_ref, x_ref, o_ref):
    tr, lanes = x_ref.shape  # static block shape

    # Global element index of every lane in this block (uint32 counter).
    base = pl.program_id(0).astype(jnp.uint32) * jnp.uint32(tr)
    ri = lax.broadcasted_iota(jnp.int32, (tr, lanes), 0).astype(jnp.uint32)
    ci = lax.broadcasted_iota(jnp.int32, (tr, lanes), 1).astype(jnp.uint32)
    idx = (base + ri) * jnp.uint32(lanes) + ci

    # Stateless 32-bit mix of (index, seed) -> uniform random bits per element.
    seed = seed_ref[0].astype(jnp.uint32)
    z = idx * jnp.uint32(0x9E3779B9) + seed
    z = (z ^ (z >> jnp.uint32(16))) * jnp.uint32(0x21F0AAAD)
    z = (z ^ (z >> jnp.uint32(15))) * jnp.uint32(0x735A2D97)
    z = z ^ (z >> jnp.uint32(15))

    # Top 24 bits -> U[0, 1).
    u01 = (z >> jnp.uint32(8)).astype(jnp.float32) * jnp.float32(1.0 / (1 << 24))

    # round(clamp((x+1)/2 + u - 0.5, 0, 1)) * 2 - 1  ==  where(x/2 + u > 0.5, +1, -1)
    x = x_ref[...].astype(jnp.float32)
    pred = x * jnp.float32(0.5) + u01 > jnp.float32(0.5)
    o_ref[...] = jnp.where(pred, jnp.float32(1.0), jnp.float32(-1.0)).astype(o_ref.dtype)


@jax.jit
def stochastic_input_binarizer(x: jax.Array, seed: jax.Array) -> jax.Array:
    """Elementwise stochastic binarization of `x` (any shape) -> {-1, +1}."""
    orig_shape = x.shape
    flat = x.reshape(-1)
    n = flat.shape[0]

    # Pad only to a lane multiple (no-op for the common conv case).
    rem = n % _LANE
    if rem:
        flat = jnp.pad(flat, (0, _LANE - rem))
    rows = flat.shape[0] // _LANE
    slab = flat.reshape(rows, _LANE)

    tr = min(_TILE_ROWS, _round_up(rows, _SUBLANE))
    grid = pl.cdiv(rows, tr)
    seed_arr = jnp.asarray(seed, dtype=jnp.int32).reshape((1,))

    out = pl.pallas_call(
        _stoch_binarize_kernel,
        out_shape=jax.ShapeDtypeStruct((rows, _LANE), x.dtype),
        grid_spec=pltpu.PrefetchScalarGridSpec(
            num_scalar_prefetch=1,
            grid=(grid,),
            in_specs=[pl.BlockSpec((tr, _LANE), lambda i, seed_ref: (i, 0))],
            out_specs=pl.BlockSpec((tr, _LANE), lambda i, seed_ref: (i, 0)),
        ),
        compiler_params=pltpu.CompilerParams(
            dimension_semantics=("parallel",),
        ),
    )(seed_arr, slab)

    out_flat = out.reshape(-1)
    if rem:
        out_flat = out_flat[:n]
    return out_flat.reshape(orig_shape)


if __name__ == "__main__":
    key = jax.random.PRNGKey(0)
    # NCHW conv-style input, small shapes.
    x = jax.random.normal(key, (2, 4, 16, 16), dtype=jnp.float32)

    y = stochastic_input_binarizer(x, jnp.int32(0))
    y = jax.block_until_ready(y)

    # Sanity checks: same shape/dtype, values in {-1, +1}, and the deterministic
    # tails of the hard-sigmoid probability: x > 1 -> +1 always, x < -1 -> -1 always.
    assert y.shape == x.shape and y.dtype == x.dtype
    assert bool(jnp.all(jnp.abs(y) == 1.0))
    assert bool(jnp.all(jnp.where(x > 1.0, y, 1.0) == 1.0))
    assert bool(jnp.all(jnp.where(x < -1.0, y, -1.0) == -1.0))

    print("KERNEL_OK")
</pallas_src>

<mosaic_0001>
module attributes {stable_mosaic.version = 11 : i64} {
  func.func @_stoch_binarize_kernel(%arg0: i32, %arg1: memref<1xi32, #tpu.memory_space<smem>>, %arg2: memref<16x128xf32, #tpu.memory_space<vmem>>, %arg3: memref<16x128xf32, #tpu.memory_space<vmem>>) attributes {dimension_semantics = [#tpu.dimension_semantics<parallel>], iteration_bounds = array<i64: 1>, scalar_prefetch = 1 : i64, scratch_operands = 0 : i64, tpu.core_type = #tpu.core_type<tc>, window_params = [{transform_indices = @transform_0, window_bounds = array<i64: 16, 128>}, {transform_indices = @transform_1, window_bounds = array<i64: 16, 128>}]} {
    %c16_i32 = arith.constant 16 : i32
    %0 = arith.muli %arg0, %c16_i32 : i32
    %1 = tpu.iota {dimensions = array<i32: 0>} : vector<16x128xi32>
    %2 = tpu.iota {dimensions = array<i32: 1>} : vector<16x128xi32>
    %3 = vector.broadcast %0 : i32 to vector<16x128xi32>
    %4 = arith.addi %3, %1 : vector<16x128xi32>
    %c128_i32 = arith.constant 128 : i32
    %5 = vector.broadcast %c128_i32 : i32 to vector<16x128xi32>
    %6 = arith.muli %4, %5 : vector<16x128xi32>
    %7 = arith.addi %6, %2 : vector<16x128xi32>
    %c0 = arith.constant 0 : index
    %8 = memref.load %arg1[%c0] : memref<1xi32, #tpu.memory_space<smem>>
    %c-1640531527_i32 = arith.constant -1640531527 : i32
    %9 = vector.broadcast %c-1640531527_i32 : i32 to vector<16x128xi32>
    %10 = arith.muli %7, %9 : vector<16x128xi32>
    %11 = vector.broadcast %8 : i32 to vector<16x128xi32>
    %12 = arith.addi %10, %11 : vector<16x128xi32>
    %c16_i32_0 = arith.constant 16 : i32
    %13 = vector.broadcast %c16_i32_0 : i32 to vector<16x128xi32>
    %14 = arith.shrui %12, %13 : vector<16x128xi32>
    %15 = arith.xori %12, %14 : vector<16x128xi32>
    %c569420461_i32 = arith.constant 569420461 : i32
    %16 = vector.broadcast %c569420461_i32 : i32 to vector<16x128xi32>
    %17 = arith.muli %15, %16 : vector<16x128xi32>
    %c15_i32 = arith.constant 15 : i32
    %18 = vector.broadcast %c15_i32 : i32 to vector<16x128xi32>
    %19 = arith.shrui %17, %18 : vector<16x128xi32>
    %20 = arith.xori %17, %19 : vector<16x128xi32>
    %c1935289751_i32 = arith.constant 1935289751 : i32
    %21 = vector.broadcast %c1935289751_i32 : i32 to vector<16x128xi32>
    %22 = arith.muli %20, %21 : vector<16x128xi32>
    %c15_i32_1 = arith.constant 15 : i32
    %23 = vector.broadcast %c15_i32_1 : i32 to vector<16x128xi32>
    %24 = arith.shrui %22, %23 : vector<16x128xi32>
    %25 = arith.xori %22, %24 : vector<16x128xi32>
    %c8_i32 = arith.constant 8 : i32
    %26 = vector.broadcast %c8_i32 : i32 to vector<16x128xi32>
    %27 = arith.shrui %25, %26 : vector<16x128xi32>
    %28 = arith.uitofp %27 : vector<16x128xi32> to vector<16x128xf32>
    %cst = arith.constant 5.96046448E-8 : f32
    %29 = vector.broadcast %cst : f32 to vector<16x128xf32>
    %30 = arith.mulf %28, %29 : vector<16x128xf32>
    %c0_2 = arith.constant 0 : index
    %c0_3 = arith.constant 0 : index
    %31 = vector.load %arg2[%c0_2, %c0_3] : memref<16x128xf32, #tpu.memory_space<vmem>>, vector<16x128xf32>
    %cst_4 = arith.constant 5.000000e-01 : f32
    %32 = vector.broadcast %cst_4 : f32 to vector<16x128xf32>
    %33 = arith.mulf %31, %32 : vector<16x128xf32>
    %34 = arith.addf %33, %30 : vector<16x128xf32>
    %cst_5 = arith.constant 5.000000e-01 : f32
    %35 = vector.broadcast %cst_5 : f32 to vector<16x128xf32>
    %36 = arith.cmpf ogt, %34, %35 : vector<16x128xf32>
    %cst_6 = arith.constant 1.000000e+00 : f32
    %cst_7 = arith.constant -1.000000e+00 : f32
    %37 = vector.broadcast %cst_6 : f32 to vector<16x128xf32>
    %38 = vector.broadcast %cst_7 : f32 to vector<16x128xf32>
    %39 = arith.select %36, %37, %38 : vector<16x128xi1>, vector<16x128xf32>
    %c0_8 = arith.constant 0 : index
    %c0_9 = arith.constant 0 : index
    %40 = vector.load %arg3[%c0_8, %c0_9] : memref<16x128xf32, #tpu.memory_space<vmem>>, vector<16x128xf32>
    tpu.vector_store %arg3[%c0_8, %c0_9], %39 {strides = array<i32>} : memref<16x128xf32, #tpu.memory_space<vmem>>, vector<16x128xf32>,
    return
  }
  func.func @transform_0(%arg0: i32, %arg1: memref<1xi32, #tpu.memory_space<smem>>) -> (i32, i32) {
    %c0_i32 = arith.constant 0 : i32
    %c0_i32_0 = arith.constant 0 : i32
    return %arg0, %c0_i32 : i32, i32
  }
  func.func @transform_1(%arg0: i32, %arg1: memref<1xi32, #tpu.memory_space<smem>>) -> (i32, i32) {
    %c0_i32 = arith.constant 0 : i32
    %c0_i32_0 = arith.constant 0 : i32
    return %arg0, %c0_i32 : i32, i32
  }
}

</mosaic_0001>

<bundles_post_ra>
// kernel: stochastic_input_binarizer.1
= control target key start
LH: loop header
LB: loop body
LE: loop exit
PB: predicated region body
PF: predicated region fallthrough
CT: control target
= control target key end

     0   :  { %v11_v0 = vlaneseq  ;;  %v78_v51 = vmov -1.0   ;;  %s109_s0 = inlined_call_operand.<no memory space> [shape: s32[1], index: 0, kind: input, shape index: {}]   ;;  %s110_s1 = inlined_call_operand.vmem [shape: f32[16,128], index: 1, kind: input, shape index: {}]   ;;  %s111_s2 = inlined_call_operand.vmem [shape: f32[16,128], index: 2, kind: output, shape index: {}]  }
   0x1   :  { %v26_v7 = vstv %s109_s0  ;;  %v61_v37 = vld [vmem:[%s110_s1] sm:$0xff]  ;;  %v62_v41 = vld [vmem:[%s110_s1 + $0x8] sm:$0xff] }
   0x2   :  { %v12_v1 = vshrl.u32 %v11_v0, 7  ;;  %v15_v2 = vand.u32 127, %v11_v0  ;;  %v63_v43 = vmul.f32 0.5, %v61_v37  ;;  %v64_v47 = vmul.f32 0.5, %v62_v41 }
   0x4   :  { %v19_v3 = vmul.u32 128, %v12_v1  ;;  %v13_v4 = vadd.s32 8, %v12_v1 }
   0x6   :  { %v21_v5 = vadd.s32 %v19_v3, %v15_v2  ;;  %v20_v6 = vmul.u32 128, %v13_v4 }
   0x8   :  { %v24_v8 = vmul.u32 2654435769, %v21_v5  ;;  %v22_v9 = vadd.s32 %v20_v6, %v15_v2 }
   0xa   :  { %v27_v10 = vadd.s32 %v26_v7, %v24_v8  ;;  %v25_v11 = vmul.u32 2654435769, %v22_v9 }
   0xc   :  { %v29_v12 = vshrl.u32 %v27_v10, 16  ;;  %v28_v13 = vadd.s32 %v26_v7, %v25_v11 }
   0xe   :  { %v31_v14 = vxor.u32 %v29_v12, %v27_v10  ;;  %v30_v15 = vshrl.u32 %v28_v13, 16 }
  0x10   :  { %v33_v16 = vmul.u32 569420461, %v31_v14  ;;  %v32_v17 = vxor.u32 %v30_v15, %v28_v13 }
  0x12   :  { %v35_v18 = vshrl.u32 %v33_v16, 15  ;;  %v34_v19 = vmul.u32 569420461, %v32_v17 }
  0x14   :  { %v37_v20 = vxor.u32 %v35_v18, %v33_v16  ;;  %v36_v21 = vshrl.u32 %v34_v19, 15 }
  0x16   :  { %v39_v22 = vmul.u32 1935289751, %v37_v20  ;;  %v38_v23 = vxor.u32 %v36_v21, %v34_v19 }
  0x18   :  { %v41_v24 = vshrl.u32 %v39_v22, 15  ;;  %v40_v25 = vmul.u32 1935289751, %v38_v23 }
  0x1a   :  { %v43_v26 = vxor.u32 %v41_v24, %v39_v22  ;;  %v42_v27 = vshrl.u32 %v40_v25, 15 }
  0x1c   :  { %v45_v28 = vshrl.u32 %v43_v26, 8  ;;  %v44_v29 = vxor.u32 %v42_v27, %v40_v25 }
  0x1e   :  { %v47_v30 = vshrl.u32 %v45_v28, 16  ;;  %v48_v31 = vand.u32 65535, %v45_v28  ;;  %v46_v32 = vshrl.u32 %v44_v29, 8 }
  0x20   :  { %v49_v33 = vcvt.s32.f32 %v47_v30  ;;  %v51_v34 = vcvt.s32.f32 %v48_v31  ;;  %v53_v35 = vshrl.u32 %v46_v32, 16  ;;  %v54_v36 = vand.u32 65535, %v46_v32 }
  0x22   :  { %v50_v38 = vmul.f32 65536.0, %v49_v33  ;;  %v55_v39 = vcvt.s32.f32 %v53_v35  ;;  %v57_v40 = vcvt.s32.f32 %v54_v36 }
  0x24   :  { %v52_v42 = vadd.f32 %v51_v34, %v50_v38  ;;  %v56_v44 = vmul.f32 65536.0, %v55_v39 }
  0x26   :  { %v59_v45 = vmul.f32 5.9604645e-08, %v52_v42  ;;  %v58_v46 = vadd.f32 %v57_v40, %v56_v44 }
  0x28   :  { %v65_v48 = vadd.f32 %v63_v43, %v59_v45  ;;  %v60_v49 = vmul.f32 5.9604645e-08, %v58_v46 }
  0x2a   :  { %vm67_vm0 = vcmp.gt.f32.partialorder %v65_v48, 0.5  ;;  %v66_v50 = vadd.f32 %v64_v47, %v60_v49 }
  0x2b   :  { %v69_v52 = vsel %vm67_vm0, 1.0, %v78_v51 }
  0x2c   :  { %71 = vst [vmem:[%s111_s2] sm:$0xff] %v69_v52  ;;  %vm68_vm1 = vcmp.gt.f32.partialorder %v66_v50, 0.5 }
  0x2d   :  { %v70_v53 = vsel %vm68_vm1, 1.0, %v78_v51 }
  0x2e   :  { %72 = vst [vmem:[%s111_s2 + $0x8] sm:$0xff] %v70_v53 }

</bundles_post_ra>
